<compile_context>
chip_gen: v5e
topology: v5e:2x2
jax: 0.10.0
libtpu: 0.0.40
codegen_flags: <defaults>
</compile_context>

<pallas_src>
import jax
import jax.numpy as jnp
from jax import lax
from jax.experimental import pallas as pl
from jax.experimental.pallas import tpu as pltpu


def _mm_cat_kernel(x_ref, o_ref):
    n = x_ref.shape[0]
    x = x_ref[...]
    # t = x @ x  (MXU matmul, f32 accumulation, explicit precision)
    t = jnp.dot(
        x,
        x,
        preferred_element_type=jnp.float32,
        precision=lax.Precision.HIGHEST,
    ).astype(o_ref.dtype)
    # out = cat([t, t], axis=0) — two static-slice stores (free Ref views),
    # avoiding the vreg shuffle a materialized concatenate would incur.
    o_ref[:n, :] = t
    o_ref[n:, :] = t


def mm_cat(x: jax.Array) -> jax.Array:
    """Computes concatenate([x @ x, x @ x], axis=0) via a Pallas TPU kernel."""
    n, m = x.shape
    assert n == m, "torch.mm(input, input) requires a square input"
    itemsize = jnp.dtype(x.dtype).itemsize
    return pl.pallas_call(
        _mm_cat_kernel,
        out_shape=jax.ShapeDtypeStruct((2 * n, n), x.dtype),
        in_specs=[pl.BlockSpec(memory_space=pltpu.MemorySpace.VMEM)],
        out_specs=pl.BlockSpec(memory_space=pltpu.MemorySpace.VMEM),
        cost_estimate=pl.CostEstimate(
            flops=2 * n * n * n,
            bytes_accessed=(n * n + 2 * n * n) * itemsize,  # in + 2x out
            transcendentals=0,
        ),
    )(x)


if __name__ == "__main__":
    key = jax.random.PRNGKey(0)
    n = 32
    x = jax.random.normal(key, (n, n), dtype=jnp.float32)

    out = mm_cat(x)
    jax.block_until_ready(out)

    # Reference check against plain JAX (matching precision)
    t_ref = jnp.dot(x, x, precision=lax.Precision.HIGHEST)
    ref = jnp.concatenate([t_ref, t_ref], axis=0)
    assert out.shape == (2 * n, n)
    assert jnp.allclose(out, ref, atol=1e-4, rtol=1e-4)

    print("KERNEL_OK")
</pallas_src>

<mosaic_0001>
module attributes {stable_mosaic.version = 11 : i64} {
  func.func @_mm_cat_kernel(%arg0: memref<32x32xf32, #tpu.memory_space<vmem>>, %arg1: memref<64x32xf32, #tpu.memory_space<vmem>>) attributes {dimension_semantics = [], scalar_prefetch = 0 : i64, scratch_operands = 0 : i64, tpu.core_type = #tpu.core_type<tc>} {
    %c0 = arith.constant 0 : index
    %c0_0 = arith.constant 0 : index
    %0 = vector.load %arg0[%c0, %c0_0] : memref<32x32xf32, #tpu.memory_space<vmem>>, vector<32x32xf32>
    %cst = arith.constant dense<0.000000e+00> : vector<32x32xf32>
    %1 = tpu.matmul %0, %0, %cst {dimension_numbers = #tpu.dot_dimension_numbers<[1], [0], [0], [1], [0, 0, 1, 1], [], []>, precision = #tpu.contract_precision<fp32>} : vector<32x32xf32>, vector<32x32xf32>, vector<32x32xf32> -> vector<32x32xf32>
    %c0_1 = arith.constant 0 : index
    %c0_2 = arith.constant 0 : index
    %2 = vector.load %arg1[%c0_1, %c0_2] : memref<64x32xf32, #tpu.memory_space<vmem>>, vector<32x32xf32>
    tpu.vector_store %arg1[%c0_1, %c0_2], %1 {strides = array<i32>} : memref<64x32xf32, #tpu.memory_space<vmem>>, vector<32x32xf32>,
    %c32 = arith.constant 32 : index
    %c0_3 = arith.constant 0 : index
    %3 = vector.load %arg1[%c32, %c0_3] : memref<64x32xf32, #tpu.memory_space<vmem>>, vector<32x32xf32>
    tpu.vector_store %arg1[%c32, %c0_3], %1 {strides = array<i32>} : memref<64x32xf32, #tpu.memory_space<vmem>>, vector<32x32xf32>,
    return
  }
}

</mosaic_0001>

<bundles_post_ra>
// kernel: tpu_custom_call.1
= control target key start
LH: loop header
LB: loop body
LE: loop exit
PB: predicated region body
PF: predicated region fallthrough
CT: control target
= control target key end

     0   :  { %6 = vsyncpa [#allocation3], 0  ;;  %s369_s9 = smov [#allocation2]   ;;  %s370_s11 = smov 128   ;;  %s491_s0 = inlined_call_operand.hbm [shape: f32[32,32], index: 0, kind: input, shape index: {}]   ;;  %s492_s1 = inlined_call_operand.vmem [shape: f32[64,32], index: 1, kind: output, shape index: {}]  }
   0x1   :  { %s11_s8 = sshll.u32 %s491_s0, 4  ;;  %s13_s10 = sshll.u32 %s369_s9, 4  ;;  %s12_s8 = int_to_ptr.hbm [resolvable:$true] %s11_s8  ;;  %s14_s10 = int_to_ptr.vmem [resolvable:$true] %s13_s10 }
   0x2   :  { %s371_s12 = smov 8  }
   0x3   :  { %19 = dma.hbm_to_vmem [thread:$0]  %s12_s8, 512, %s14_s10, [#allocation3], %s370_s11, %s370_s11, %s371_s12  }
   0x4   :  { %367 = dma.done.wait [#allocation3], 512  }
   0x5   :  { %368 = vsyncadd [#allocation3], 4294966784  ;;  %vm28_vm0 = vcmask 261120   ;;  %v27_v0 = vld [vmem:[#allocation2 + $0x18] sm:$0xff]  ;;  %v26_v1 = vld [vmem:[#allocation2 + $0x10] sm:$0xff] }
   0x6   :  { %v25_v2 = vld [vmem:[#allocation2 + $0x8] sm:$0xff]  ;;  %v385_v3 = vand.u32 4294901760, %v27_v0  ;;  %v387_v4 = vand.u32 4294901760, %v26_v1  ;;  %v24_v6 = vld [vmem:[#allocation2] sm:$0xff]  ;;  %v36_v7 = vsel %vm28_vm0, %v26_v1, 0  ;;  %v39_v10 = vsel %vm28_vm0, %v27_v0, 0 }
   0x7   :  { %v389_v5 = vand.u32 4294901760, %v25_v2  ;;  %v392_v8 = vand.u32 4294901760, %v24_v6  ;;  %v394_v9 = vand.u32 4294901760, %v36_v7  ;;  %v30_v11 = vsel %vm28_vm0, %v24_v6, 0 }
   0x8   :  { %332 = vmatpush.msra.mxu2 %v385_v3  ;;  %v107_v12 = vsub.f32 %v27_v0, %v385_v3  ;;  %v113_v13 = vsub.f32 %v26_v1, %v387_v4  ;;  %54 = vmatpush.msra.mxu0 %v385_v3  ;;  %v403_v15 = vand.u32 4294901760, %v39_v10  ;;  %v409_v18 = vand.u32 4294901760, %v30_v11 }
   0x9   :  { %v119_v14 = vsub.f32 %v25_v2, %v389_v5  ;;  %v406_v16 = vsub.f32 %v36_v7, %v394_v9  ;;  %v125_v17 = vsub.f32 %v24_v6, %v392_v8  ;;  %v33_v19 = vsel %vm28_vm0, %v25_v2, 0 }
   0xa   :  { %333 = vmatpush.msra.mxu2 %v387_v4  ;;  %v108_v20 = vand.u32 4294901760, %v107_v12  ;;  %v114_v21 = vand.u32 4294901760, %v113_v13  ;;  %v414_v23 = vsub.f32 %v39_v10, %v403_v15  ;;  %56 = vmatpush.msra.mxu0 %v387_v4  ;;  %v62_v26 = vsub.f32 %v30_v11, %v409_v18 }
   0xb   :  { %v120_v22 = vand.u32 4294901760, %v119_v14  ;;  %v79_v24 = vand.u32 4294901760, %v406_v16  ;;  %v126_v25 = vand.u32 4294901760, %v125_v17  ;;  %v419_v27 = vand.u32 4294901760, %v33_v19 }
   0xc   :  { %334 = vmatpush.msra.mxu2 %v389_v5  ;;  %v109_v28 = vsub.f32 %v107_v12, %v108_v20  ;;  %v115_v29 = vsub.f32 %v113_v13, %v114_v21  ;;  %58 = vmatpush.msra.mxu0 %v389_v5  ;;  %v87_v32 = vand.u32 4294901760, %v414_v23  ;;  %v63_v33 = vand.u32 4294901760, %v62_v26 }
   0xd   :  { %v121_v30 = vsub.f32 %v119_v14, %v120_v22  ;;  %v80_v31 = vsub.f32 %v406_v16, %v79_v24  ;;  %v70_v34 = vsub.f32 %v33_v19, %v419_v27  ;;  %v127_v37 = vsub.f32 %v125_v17, %v126_v25 }
   0xe   :  { %335 = vmatpush.msra.mxu2 %v392_v8  ;;  %v110_v35 = vand.u32 4294901760, %v109_v28  ;;  %v116_v36 = vand.u32 4294901760, %v115_v29  ;;  %60 = vmatpush.msra.mxu0 %v392_v8  ;;  %v64_v39 = vsub.f32 %v62_v26, %v63_v33  ;;  %v88_v42 = vsub.f32 %v414_v23, %v87_v32 }
   0xf   :  { %v81_v38 = vand.u32 4294901760, %v80_v31  ;;  %v71_v40 = vand.u32 4294901760, %v70_v34  ;;  %v122_v41 = vand.u32 4294901760, %v121_v30  ;;  %v128_v44 = vand.u32 4294901760, %v127_v37 }
  0x10   :  { %161 = vmatpush.msrb.mxu2 %v107_v12  ;;  %252 = vmatpush.msrb.mxu0 %v108_v20  ;;  %v65_v43 = vand.u32 4294901760, %v64_v39  ;;  %v89_v46 = vand.u32 4294901760, %v88_v42 }
  0x11   :  { %336 = vmatpush.msra.mxu3 %v110_v35  ;;  %111 = vmatpush.msra.mxu1 %v110_v35  ;;  %v72_v45 = vsub.f32 %v70_v34, %v71_v40 }
  0x12   :  { %82 = vmatmul.f32.vlgmr.msra.gmra.mxu2 %v81_v38  ;;  %256 = vmatpush.msrb.mxu0 %v114_v21 }
  0x13   :  { %337 = vmatpush.msra.mxu3 %v116_v36  ;;  %164 = vmatpush.msrb.mxu2 %v113_v13  ;;  %v73_v47 = vand.u32 4294901760, %v72_v45 }
  0x14   :  { %117 = vmatpush.msra.mxu1 %v116_v36  ;;  %66 = vmatmul.f32.vlgmr.msra.gmra.mxu0 %v65_v43 }
  0x15   :  { %338 = vmatpush.msra.mxu3 %v122_v41  ;;  %167 = vmatpush.msrb.mxu2 %v119_v14 }
  0x16   :  { %123 = vmatpush.msra.mxu1 %v122_v41  ;;  %260 = vmatpush.msrb.mxu0 %v120_v22 }
  0x17   :  { %339 = vmatpush.msra.mxu3 %v128_v44  ;;  %170 = vmatpush.msrb.mxu2 %v125_v17 }
  0x18   :  { %139 = vmatmul.f32.vlgmr.msra.gmra.mxu3 %v394_v9  ;;  %129 = vmatpush.msra.mxu1 %v128_v44 }
  0x19   :  { %205 = vmatpush.msrb.mxu3 %v385_v3  ;;  %131 = vmatmul.f32.vlgmr.msra.gmra.mxu1 %v409_v18 }
  0x1a   :  { %90 = vmatmul.f32.gmra.mxu2 %v89_v46  ;;  %295 = vmatpush.msrb.mxu1 %v385_v3 }
  0x1b   :  { %207 = vmatpush.msrb.mxu3 %v387_v4  ;;  %264 = vmatpush.msrb.mxu0 %v126_v25 }
  0x1c   :  { %297 = vmatpush.msrb.mxu1 %v387_v4  ;;  %74 = vmatmul.f32.gmra.mxu0 %v73_v47 }
  0x1d   :  { %209 = vmatpush.msrb.mxu3 %v389_v5 }
  0x1e   :  { %299 = vmatpush.msrb.mxu1 %v389_v5 }
  0x1f   :  { %211 = vmatpush.msrb.mxu3 %v392_v8 }
  0x20   :  { %143 = vmatmul.f32.gmra.mxu3 %v403_v15  ;;  %301 = vmatpush.msrb.mxu1 %v392_v8 }
  0x21   :  { %135 = vmatmul.f32.gmra.mxu1 %v419_v27 }
  0x22   :  { %173 = vmatmul.f32.vlgmr.msrb.gmra.mxu2 %v62_v26 }
  0x24   :  { %266 = vmatmul.f32.vlgmr.msrb.gmra.mxu0 %v409_v18 }
  0x28   :  { %215 = vmatmul.f32.vlgmr.msrb.gmra.mxu3 %v63_v33 }
  0x29   :  { %303 = vmatmul.f32.vlgmr.msrb.gmra.mxu1 %v409_v18 }
  0x2a   :  { %178 = vmatmul.f32.gmra.mxu2 %v70_v34 }
  0x2c   :  { %270 = vmatmul.f32.gmra.mxu0 %v419_v27 }
  0x30   :  { %221 = vmatmul.f32.gmra.mxu3 %v71_v40 }
  0x31   :  { %307 = vmatmul.f32.gmra.mxu1 %v419_v27 }
  0x32   :  { %183 = vmatmul.f32.gmra.mxu2 %v406_v16 }
  0x34   :  { %274 = vmatmul.f32.gmra.mxu0 %v394_v9 }
  0x38   :  { %227 = vmatmul.f32.gmra.mxu3 %v79_v24 }
  0x39   :  { %311 = vmatmul.f32.gmra.mxu1 %v394_v9 }
  0x3a   :  { %188 = vmatmul.f32.gmra.mxu2 %v414_v23 }
  0x3c   :  { %278 = vmatmul.f32.gmra.mxu0 %v403_v15 }
  0x40   :  { %233 = vmatmul.f32.gmra.mxu3 %v87_v32 }
  0x41   :  { %315 = vmatmul.f32.gmra.mxu1 %v403_v15 }
  0x91   :  { %v67_v48 = vpop.f32.mrf.mxu0 }
  0x95   :  { %v83_v49 = vpop.f32.mrf.mxu2 }
  0x96   :  { %v132_v50 = vpop.f32.mrf.mxu1 }
  0x97   :  { %v133_v59 = vadd.f32 %v132_v50, %v67_v48 }
  0x99   :  { %v75_v52 = vpop.f32.mrf.mxu0 }
  0x9b   :  { %v140_v51 = vpop.f32.mrf.mxu3 }
  0x9c   :  { %v141_v10 = vadd.f32 %v140_v51, %v83_v49 }
  0x9d   :  { %v91_v53 = vpop.f32.mrf.mxu2 }
  0x9e   :  { %v136_v54 = vpop.f32.mrf.mxu1 }
  0x9f   :  { %v137_v2 = vadd.f32 %v136_v54, %v75_v52 }
  0xa1   :  { %v267_v57 = vpop.f32.mrf.mxu0 }
  0xa3   :  { %v144_v55 = vpop.f32.mrf.mxu3 }
  0xa4   :  { %v145_v19 = vadd.f32 %v144_v55, %v91_v53 }
  0xa5   :  { %v174_v56 = vpop.f32.mrf.mxu2 }
  0xa6   :  { %v304_v58 = vpop.f32.mrf.mxu1  ;;  %v175_v60 = vadd.f32 %v174_v56, %v133_v59 }
  0xa9   :  { %v271_v1 = vpop.f32.mrf.mxu0 }
  0xab   :  { %v216_v61 = vpop.f32.mrf.mxu3 }
  0xac   :  { %v217_v62 = vadd.f32 %v216_v61, %v175_v60 }
  0xad   :  { %v179_v63 = vpop.f32.mrf.mxu2 }
  0xae   :  { %v268_v0 = vadd.f32 %v267_v57, %v217_v62  ;;  %v308_v4 = vpop.f32.mrf.mxu1  ;;  %v180_v5 = vadd.f32 %v179_v63, %v137_v2 }
  0xb0   :  { %v305_v3 = vadd.f32 %v304_v58, %v268_v0 }
  0xb1   :  { %v275_v12 = vpop.f32.mrf.mxu0 }
  0xb2   :  { %319 = vst.msk [vmem:[%s492_s1] sm:$0xff] %vm28_vm0, %v305_v3 }
  0xb3   :  { %323 = vst.msk [vmem:[%s492_s1 + $0x20] sm:$0xff] %vm28_vm0, %v305_v3  ;;  %v222_v6 = vpop.f32.mrf.mxu3 }
  0xb4   :  { %v223_v7 = vadd.f32 %v222_v6, %v180_v5 }
  0xb5   :  { %v184_v8 = vpop.f32.mrf.mxu2 }
  0xb6   :  { %v272_v9 = vadd.f32 %v271_v1, %v223_v7  ;;  %v185_v13 = vadd.f32 %v184_v8, %v141_v10  ;;  %v312_v15 = vpop.f32.mrf.mxu1 }
  0xb8   :  { %v309_v11 = vadd.f32 %v308_v4, %v272_v9 }
  0xb9   :  { %v279_v23 = vpop.f32.mrf.mxu0 }
  0xba   :  { %320 = vst.msk [vmem:[%s492_s1 + $0x8] sm:$0xff] %vm28_vm0, %v309_v11 }
  0xbb   :  { %324 = vst.msk [vmem:[%s492_s1 + $0x28] sm:$0xff] %vm28_vm0, %v309_v11  ;;  %v228_v14 = vpop.f32.mrf.mxu3 }
  0xbc   :  { %v229_v16 = vadd.f32 %v228_v14, %v185_v13 }
  0xbd   :  { %v189_v18 = vpop.f32.mrf.mxu2 }
  0xbe   :  { %v276_v17 = vadd.f32 %v275_v12, %v229_v16  ;;  %v190_v21 = vadd.f32 %v189_v18, %v145_v19  ;;  %v316_v25 = vpop.f32.mrf.mxu1 }
  0xc0   :  { %v313_v20 = vadd.f32 %v312_v15, %v276_v17 }
  0xc2   :  { %321 = vst.msk [vmem:[%s492_s1 + $0x10] sm:$0xff] %vm28_vm0, %v313_v20 }
  0xc3   :  { %325 = vst.msk [vmem:[%s492_s1 + $0x30] sm:$0xff] %vm28_vm0, %v313_v20  ;;  %v234_v22 = vpop.f32.mrf.mxu3 }
  0xc4   :  { %v235_v24 = vadd.f32 %v234_v22, %v190_v21 }
  0xc6   :  { %v280_v26 = vadd.f32 %v279_v23, %v235_v24 }
  0xc8   :  { %v317_v27 = vadd.f32 %v316_v25, %v280_v26 }
  0xca   :  { %322 = vst.msk [vmem:[%s492_s1 + $0x18] sm:$0xff] %vm28_vm0, %v317_v27 }
  0xcb   :  { %326 = vst.msk [vmem:[%s492_s1 + $0x38] sm:$0xff] %vm28_vm0, %v317_v27 }
  0xcc   :  { %331 = vsyncpa [#allocation3], 1 }

</bundles_post_ra>
